<compile_context>
chip_gen: v6e
topology: v6e:2x2x1
jax: 0.10.0
libtpu: 0.0.40
codegen_flags: <defaults>
</compile_context>

<pallas_src>
import math

import jax
import jax.numpy as jnp
from jax import lax
from jax.experimental import pallas as pl
from jax.experimental.pallas import tpu as pltpu


def _round_up(n: int, m: int) -> int:
    return ((n + m - 1) // m) * m


def _round_down(n: int, m: int) -> int:
    return (n // m) * m


_CHUNK_ROWS = 512  # in-kernel row chunk: keeps the per-chunk MLP chain in vregs


def _actor_kernel_factory(n_layers: int, max_output: float):
    """Fused MLP kernel in natural batch-major ([batch_tile, features]) layout.

    Ref order: x_ref, (w1, b1, ..., wN, bN), o_ref
      x_ref : [tb, in_dim]
      w_i   : [out_i, in_i]   (PyTorch nn.Linear layout)
      b_i   : [1, out_i]
      o_ref : [tb, out_dim]
    """

    def kernel(*refs):
        x_ref = refs[0]
        o_ref = refs[-1]

        # Tiny weights/biases: load once per grid step (resident in VMEM anyway).
        ws = [refs[1 + 2 * li][...] for li in range(n_layers)]
        bs = [refs[2 + 2 * li][...] for li in range(n_layers)]

        def mlp(xc):
            h = xc
            for li in range(n_layers):
                # [rows, in] x [out, in]^T -> [rows, out]; f32 accumulation on MXU.
                h = lax.dot_general(h, ws[li], (((1,), (1,)), ((), ())),
                                    preferred_element_type=jnp.float32)
                h = h + bs[li]                       # bias broadcasts over rows
                if li < n_layers - 1:
                    h = jnp.maximum(h, 0.0)          # ReLU (VPU)
                else:
                    h = max_output * jnp.tanh(h)     # Tanh (EUP) + action-range scale
            return h

        tb = x_ref.shape[0]  # static block row count
        if tb > _CHUNK_ROWS and tb % _CHUNK_ROWS == 0:
            # Process the tile in row chunks so intermediates stay in vregs.
            n_chunks = tb // _CHUNK_ROWS

            def body(c, carry):
                r = pl.multiple_of(c * _CHUNK_ROWS, _CHUNK_ROWS)
                xc = x_ref[pl.ds(r, _CHUNK_ROWS), :]
                o_ref[pl.ds(r, _CHUNK_ROWS), :] = mlp(xc).astype(o_ref.dtype)
                return carry

            lax.fori_loop(0, n_chunks, body, 0)
        else:
            o_ref[...] = mlp(x_ref[...]).astype(o_ref.dtype)

    return kernel


def _vmem_limit_bytes() -> int:
    """Generation-aware scoped-VMEM limit with headroom below physical capacity."""
    cap = 0
    try:
        cap = int(getattr(pltpu.get_tpu_info(), "vmem_capacity_bytes", 0) or 0)
    except Exception:
        cap = 0
    if cap >= 96 * 1024 * 1024:           # v5e / v6e: 128 MiB physical
        return 64 * 1024 * 1024
    if cap > 0:                            # v7x: 64 MiB physical -> ~48 MiB
        return max(cap - 16 * 1024 * 1024, 32 * 1024 * 1024)
    return 32 * 1024 * 1024                # conservative fallback (>= v5e needs)


def actor_forward(x, params, max_output: float, *, tile_b: int = 32768):
    """Run the fused Actor MLP kernel.

    Args:
      x: [batch, input_dim] f32 state tensor (natural layout, untouched).
      params: tuple (w1, b1, ..., wN, bN) with w_i: [out, in], b_i: [1, out].
      max_output: python float action-range scale.
      tile_b: target batch tile size (rows per grid step).
    Returns:
      [batch, output_dim] f32 action tensor.
    """
    assert len(params) % 2 == 0 and len(params) >= 2
    n_layers = len(params) // 2
    batch, in_dim = x.shape
    out_dim = params[-2].shape[0]

    vmem_limit = _vmem_limit_bytes()

    # Conservative per-row f32 VMEM footprint (double-buffered x/out tiles plus all
    # layer activations) used to cap the batch tile against the VMEM budget.
    layer_widths = [params[2 * li].shape[0] for li in range(n_layers)]
    row_bytes = 4 * (2 * in_dim + 2 * out_dim + 2 * sum(layer_widths))
    budget = (vmem_limit * 3) // 4
    tb_vmem_cap = max(_round_down(budget // row_bytes, 8), 8)

    # --- batch tiling: natural layout, no over-padding --------------------------
    if batch % 8 == 0:
        b_pad, x_p = batch, x
    elif batch * row_bytes <= budget:
        # Whole batch as a single full-dim block: no padding copy needed.
        b_pad, x_p = batch, x
    else:
        # Rare corner: large batch not a multiple of 8 sublanes -> pad minimally.
        b_pad = _round_up(batch, 8)
        x_p = jnp.pad(x, ((0, b_pad - batch), (0, 0)))

    if b_pad % 8 == 0:
        tb = min(_round_up(tile_b, 8), tb_vmem_cap, b_pad)
        # v7x megacore: keep >= 2 grid steps when the batch is large enough that
        # halving the tile still amortizes per-step overhead.
        if pl.cdiv(b_pad, tb) == 1 and b_pad >= 8192:
            tb = _round_up(pl.cdiv(b_pad, 2), 8)
    else:
        tb = b_pad  # small non-multiple-of-8 batch: single full-dim block
    grid = (pl.cdiv(b_pad, tb),)

    # BlockSpecs: x/out tiled over the batch (sublane) axis with full feature rows
    # (contiguous HBM slabs); weights/biases whole-array blocks with constant
    # index_maps so they stay resident in VMEM across grid steps.
    in_specs = [pl.BlockSpec((tb, in_dim), lambda i: (i, 0))]
    flops = 0
    for li in range(n_layers):
        w = params[2 * li]
        od, idm = w.shape
        in_specs.append(pl.BlockSpec((od, idm), lambda i: (0, 0)))
        in_specs.append(pl.BlockSpec((1, od), lambda i: (0, 0)))
        flops += 2 * b_pad * od * idm

    param_bytes = sum(int(p.size) * p.dtype.itemsize for p in params)
    cost = pl.CostEstimate(
        flops=int(flops),
        transcendentals=int(b_pad * out_dim),
        bytes_accessed=int(4 * (in_dim + out_dim) * b_pad + param_bytes),
    )

    out = pl.pallas_call(
        _actor_kernel_factory(n_layers, float(max_output)),
        out_shape=jax.ShapeDtypeStruct((b_pad, out_dim), jnp.float32),
        grid=grid,
        in_specs=in_specs,
        out_specs=pl.BlockSpec((tb, out_dim), lambda i: (i, 0)),
        compiler_params=pltpu.CompilerParams(
            dimension_semantics=("parallel",),   # megacore sharding on v7x
            vmem_limit_bytes=vmem_limit,
        ),
        cost_estimate=cost,
    )(x_p, *params)

    return out if b_pad == batch else out[:batch]


def init_actor_params(key, input_dim, hidden_layers, output_dim):
    """Mirror nn.Linear default init U(-1/sqrt(fan_in), 1/sqrt(fan_in)).

    Weights in PyTorch layout [out_features, in_features]; biases as [1, out].
    """
    dims = [input_dim] + list(hidden_layers) + [output_dim]
    params = []
    for in_d, out_d in zip(dims[:-1], dims[1:]):
        key, kw, kb = jax.random.split(key, 3)
        bound = 1.0 / math.sqrt(in_d)
        w = jax.random.uniform(kw, (out_d, in_d), jnp.float32, -bound, bound)
        b = jax.random.uniform(kb, (1, out_d), jnp.float32, -bound, bound)
        params.extend([w, b])
    return tuple(params)


def actor_reference(x, params, max_output: float):
    """Plain-JAX reference for correctness checking."""
    n_layers = len(params) // 2
    h = x
    for li in range(n_layers):
        w, b = params[2 * li], params[2 * li + 1]
        h = h @ w.T + b
        if li < n_layers - 1:
            h = jnp.maximum(h, 0.0)
        else:
            h = max_output * jnp.tanh(h)
    return h


if __name__ == "__main__":
    # Actor(input_dim=8, hidden_layers=[32, 32], output_dim=4, max_output=2.0)
    input_dim, hidden_layers, output_dim, max_output = 8, [32, 32], 4, 2.0

    key = jax.random.PRNGKey(0)
    key, kx = jax.random.split(key)
    params = init_actor_params(key, input_dim, hidden_layers, output_dim)

    # Small, module-consistent batch (single full-dim block, no padding).
    x = jax.random.normal(kx, (2, input_dim), dtype=jnp.float32)
    out = jax.block_until_ready(actor_forward(x, params, max_output))
    ref = actor_reference(x, params, max_output)
    assert out.shape == (2, output_dim)
    assert jnp.allclose(out, ref, atol=1e-5, rtol=1e-5), (out, ref)

    # Larger batch exercising: multi-step grid, ragged last block (2000 % 1024 != 0),
    # and the in-kernel 512-row chunked path.
    key, kx2 = jax.random.split(key)
    x2 = jax.random.normal(kx2, (2000, input_dim), dtype=jnp.float32)
    out2 = jax.block_until_ready(actor_forward(x2, params, max_output, tile_b=1024))
    ref2 = actor_reference(x2, params, max_output)
    assert out2.shape == (2000, output_dim)
    assert jnp.allclose(out2, ref2, atol=1e-5, rtol=1e-5)

    print("KERNEL_OK")
</pallas_src>

<mosaic_0001>
module attributes {stable_mosaic.version = 11 : i64} {
  func.func @kernel(%arg0: i32, %arg1: memref<2x8xf32, #tpu.memory_space<vmem>>, %arg2: memref<32x8xf32, #tpu.memory_space<vmem>>, %arg3: memref<1x32xf32, #tpu.memory_space<vmem>>, %arg4: memref<32x32xf32, #tpu.memory_space<vmem>>, %arg5: memref<1x32xf32, #tpu.memory_space<vmem>>, %arg6: memref<4x32xf32, #tpu.memory_space<vmem>>, %arg7: memref<1x4xf32, #tpu.memory_space<vmem>>, %arg8: memref<2x4xf32, #tpu.memory_space<vmem>>) attributes {dimension_semantics = [#tpu.dimension_semantics<parallel>], iteration_bounds = array<i64: 1>, scalar_prefetch = 0 : i64, scratch_operands = 0 : i64, tpu.core_type = #tpu.core_type<tc>, window_params = [{transform_indices = @transform_0, window_bounds = array<i64: 2, 8>}, {pipeline_mode = #tpu.pipeline_mode<synchronous>, transform_indices = @transform_1, window_bounds = array<i64: 32, 8>}, {pipeline_mode = #tpu.pipeline_mode<synchronous>, transform_indices = @transform_2, window_bounds = array<i64: 1, 32>}, {pipeline_mode = #tpu.pipeline_mode<synchronous>, transform_indices = @transform_3, window_bounds = array<i64: 32, 32>}, {pipeline_mode = #tpu.pipeline_mode<synchronous>, transform_indices = @transform_4, window_bounds = array<i64: 1, 32>}, {pipeline_mode = #tpu.pipeline_mode<synchronous>, transform_indices = @transform_5, window_bounds = array<i64: 4, 32>}, {pipeline_mode = #tpu.pipeline_mode<synchronous>, transform_indices = @transform_6, window_bounds = array<i64: 1, 4>}, {transform_indices = @transform_7, window_bounds = array<i64: 2, 4>}]} {
    %c0 = arith.constant 0 : index
    %c0_0 = arith.constant 0 : index
    %0 = vector.load %arg2[%c0, %c0_0] : memref<32x8xf32, #tpu.memory_space<vmem>>, vector<32x8xf32>
    %c0_1 = arith.constant 0 : index
    %c0_2 = arith.constant 0 : index
    %1 = vector.load %arg4[%c0_1, %c0_2] : memref<32x32xf32, #tpu.memory_space<vmem>>, vector<32x32xf32>
    %c0_3 = arith.constant 0 : index
    %c0_4 = arith.constant 0 : index
    %2 = vector.load %arg6[%c0_3, %c0_4] : memref<4x32xf32, #tpu.memory_space<vmem>>, vector<4x32xf32>
    %c0_5 = arith.constant 0 : index
    %c0_6 = arith.constant 0 : index
    %3 = vector.load %arg3[%c0_5, %c0_6] : memref<1x32xf32, #tpu.memory_space<vmem>>, vector<1x32xf32>
    %c0_7 = arith.constant 0 : index
    %c0_8 = arith.constant 0 : index
    %4 = vector.load %arg5[%c0_7, %c0_8] : memref<1x32xf32, #tpu.memory_space<vmem>>, vector<1x32xf32>
    %c0_9 = arith.constant 0 : index
    %c0_10 = arith.constant 0 : index
    %5 = vector.load %arg7[%c0_9, %c0_10] : memref<1x4xf32, #tpu.memory_space<vmem>>, vector<1x4xf32>
    %c0_11 = arith.constant 0 : index
    %c0_12 = arith.constant 0 : index
    %6 = vector.load %arg1[%c0_11, %c0_12] : memref<2x8xf32, #tpu.memory_space<vmem>>, vector<2x8xf32>
    %cst = arith.constant dense<0.000000e+00> : vector<2x32xf32>
    %7 = tpu.matmul %6, %0, %cst {dimension_numbers = #tpu.dot_dimension_numbers<[1], [1], [0], [0], [0, 0, 1, 0], [], []>} : vector<2x8xf32>, vector<32x8xf32>, vector<2x32xf32> -> vector<2x32xf32>
    %8 = vector.broadcast %3 : vector<1x32xf32> to vector<2x32xf32>
    %9 = arith.addf %7, %8 : vector<2x32xf32>
    %cst_13 = arith.constant 0.000000e+00 : f32
    %10 = vector.broadcast %cst_13 : f32 to vector<2x32xf32>
    %11 = arith.maximumf %9, %10 : vector<2x32xf32>
    %cst_14 = arith.constant dense<0.000000e+00> : vector<2x32xf32>
    %12 = tpu.matmul %11, %1, %cst_14 {dimension_numbers = #tpu.dot_dimension_numbers<[1], [1], [0], [0], [0, 0, 1, 0], [], []>} : vector<2x32xf32>, vector<32x32xf32>, vector<2x32xf32> -> vector<2x32xf32>
    %13 = vector.broadcast %4 : vector<1x32xf32> to vector<2x32xf32>
    %14 = arith.addf %12, %13 : vector<2x32xf32>
    %cst_15 = arith.constant 0.000000e+00 : f32
    %15 = vector.broadcast %cst_15 : f32 to vector<2x32xf32>
    %16 = arith.maximumf %14, %15 : vector<2x32xf32>
    %cst_16 = arith.constant dense<0.000000e+00> : vector<2x4xf32>
    %17 = tpu.matmul %16, %2, %cst_16 {dimension_numbers = #tpu.dot_dimension_numbers<[1], [1], [0], [0], [0, 0, 1, 0], [], []>} : vector<2x32xf32>, vector<4x32xf32>, vector<2x4xf32> -> vector<2x4xf32>
    %18 = vector.broadcast %5 : vector<1x4xf32> to vector<2x4xf32>
    %19 = arith.addf %17, %18 : vector<2x4xf32>
    %20 = math.tanh %19 : vector<2x4xf32>
    %cst_17 = arith.constant 2.000000e+00 : f32
    %21 = vector.broadcast %cst_17 : f32 to vector<2x4xf32>
    %22 = arith.mulf %21, %20 : vector<2x4xf32>
    %c0_18 = arith.constant 0 : index
    %c0_19 = arith.constant 0 : index
    %23 = vector.load %arg8[%c0_18, %c0_19] : memref<2x4xf32, #tpu.memory_space<vmem>>, vector<2x4xf32>
    tpu.vector_store %arg8[%c0_18, %c0_19], %22 {strides = array<i32>} : memref<2x4xf32, #tpu.memory_space<vmem>>, vector<2x4xf32>,
    return
  }
  func.func @transform_0(%arg0: i32) -> (i32, i32) {
    %c0_i32 = arith.constant 0 : i32
    %c0_i32_0 = arith.constant 0 : i32
    return %arg0, %c0_i32 : i32, i32
  }
  func.func @transform_1(%arg0: i32) -> (i32, i32) {
    %c0_i32 = arith.constant 0 : i32
    %c0_i32_0 = arith.constant 0 : i32
    %c0_i32_1 = arith.constant 0 : i32
    return %c0_i32, %c0_i32_0 : i32, i32
  }
  func.func @transform_2(%arg0: i32) -> (i32, i32) {
    %c0_i32 = arith.constant 0 : i32
    %c0_i32_0 = arith.constant 0 : i32
    %c0_i32_1 = arith.constant 0 : i32
    return %c0_i32, %c0_i32_0 : i32, i32
  }
  func.func @transform_3(%arg0: i32) -> (i32, i32) {
    %c0_i32 = arith.constant 0 : i32
    %c0_i32_0 = arith.constant 0 : i32
    %c0_i32_1 = arith.constant 0 : i32
    return %c0_i32, %c0_i32_0 : i32, i32
  }
  func.func @transform_4(%arg0: i32) -> (i32, i32) {
    %c0_i32 = arith.constant 0 : i32
    %c0_i32_0 = arith.constant 0 : i32
    %c0_i32_1 = arith.constant 0 : i32
    return %c0_i32, %c0_i32_0 : i32, i32
  }
  func.func @transform_5(%arg0: i32) -> (i32, i32) {
    %c0_i32 = arith.constant 0 : i32
    %c0_i32_0 = arith.constant 0 : i32
    %c0_i32_1 = arith.constant 0 : i32
    return %c0_i32, %c0_i32_0 : i32, i32
  }
  func.func @transform_6(%arg0: i32) -> (i32, i32) {
    %c0_i32 = arith.constant 0 : i32
    %c0_i32_0 = arith.constant 0 : i32
    %c0_i32_1 = arith.constant 0 : i32
    return %c0_i32, %c0_i32_0 : i32, i32
  }
  func.func @transform_7(%arg0: i32) -> (i32, i32) {
    %c0_i32 = arith.constant 0 : i32
    %c0_i32_0 = arith.constant 0 : i32
    return %arg0, %c0_i32 : i32, i32
  }
}

</mosaic_0001>

<bundles_post_ra>
// kernel: tpu_custom_call.1
= control target key start
LH: loop header
LB: loop body
LE: loop exit
PB: predicated region body
PF: predicated region fallthrough
CT: control target
= control target key end

     0   :  { %vm46_vm0 = vcmask 64512   ;;  %v407_v1 = vmov 0.0   ;;  %vm408_vm1 = vmmov 0   ;;  %vm139_vm2 = vcmask 261120   ;;  %s507_s0 = inlined_call_operand.vmem [shape: f32[2,8], index: 0, kind: input, shape index: {}]   ;;  %s508_s1 = inlined_call_operand.vmem [shape: f32[32,8], index: 1, kind: input, shape index: {}]   ;;  %s509_s2 = inlined_call_operand.vmem [shape: f32[1,32], index: 2, kind: input, shape index: {}]   ;;  %s510_s3 = inlined_call_operand.vmem [shape: f32[32,32], index: 3, kind: input, shape index: {}]   ;;  %s511_s4 = inlined_call_operand.vmem [shape: f32[1,32], index: 4, kind: input, shape index: {}]   ;;  %s512_s5 = inlined_call_operand.vmem [shape: f32[4,32], index: 5, kind: input, shape index: {}]   ;;  %s513_s6 = inlined_call_operand.vmem [shape: f32[1,4], index: 6, kind: input, shape index: {}]   ;;  %s514_s7 = inlined_call_operand.hbm [shape: f32[2,4], index: 7, kind: output, shape index: {}]  }
   0x1   :  { %v30_v0 = vld [vmem:[%s508_s1 + $0x18] sm:$0xff]  ;;  %353 = vmatprep.subr.mxu0 %v407_v1  ;;  %361 = vmatprep.mubr.msk.f32.mxu0 %vm408_vm1, %v407_v1  ;;  %v29_v3 = vld [vmem:[%s508_s1 + $0x10] sm:$0xff] }
   0x2   :  { %v34_v2 = vld [vmem:[%s510_s3 + $0x18] sm:$0xff]  ;;  %354 = vmatpush3.xpose.msk.msra.mxu0 %vm46_vm0, %v30_v0  ;;  %364 = vmatprep.subr.mxu1 %v407_v1 }
   0x3   :  { %355 = vmatprep.subr.mxu0 %v407_v1  ;;  %365 = vmatpush3.xpose.msk.msra.mxu1 %vm139_vm2, %v34_v2 }
   0x4   :  { %12 = vsyncpa [#allocation3], 0  ;;  %366 = vmatprep.subr.mxu1 %v407_v1  ;;  %v33_v4 = vld [vmem:[%s510_s3 + $0x10] sm:$0xff]  ;;  %372 = vmatprep.mubr.msk.f32.mxu1 %vm408_vm1, %v407_v1  ;;  %v28_v5 = vld [vmem:[%s508_s1 + $0x8] sm:$0xff]  ;;  %vm310_vm3 = vcmask 25600  }
   0x5   :  { %v32_v6 = vld [vmem:[%s510_s3 + $0x8] sm:$0xff]  ;;  %v27_v7 = vld [vmem:[%s508_s1] sm:$0xff] }
   0x6   :  { %356 = vmatpush3.xpose.msk.msra.mxu0 %vm46_vm0, %v29_v3  ;;  %v39_v8 = vld [vmem:[%s507_s0] sm:$0x3] }
   0x7   :  { %357 = vmatprep.subr.mxu0 %v407_v1  ;;  %367 = vmatpush3.xpose.msk.msra.mxu1 %vm139_vm2, %v33_v4  ;;  %v31_v9 = vld [vmem:[%s510_s3] sm:$0xff] }
   0x8   :  { %368 = vmatprep.subr.mxu1 %v407_v1  ;;  %v326_v10 = vld [vmem:[%s509_s2] ss:$0 sm:$0xff] }
   0x9   :  { %v35_v15 = vld [vmem:[%s512_s5] sm:$0xf]  ;;  %s409_s5 = smov [#allocation2]  }
   0xa   :  { %358 = vmatpush3.xpose.msk.msra.mxu0 %vm46_vm0, %v28_v5  ;;  %v332_v16 = vld [vmem:[%s511_s4] ss:$0 sm:$0xff]  ;;  %s318_s23 = sshll.u32 %s409_s5, 4  ;;  %s319_s23 = int_to_ptr.vmem [resolvable:$true] %s318_s23 }
   0xb   :  { %359 = vmatprep.subr.mxu0 %v407_v1  ;;  %369 = vmatpush3.xpose.msk.msra.mxu1 %vm139_vm2, %v32_v6  ;;  %v338_v21 = vld [vmem:[%s513_s6] ss:$0 sm:$0xff]  ;;  %s385_s4 = scalar_lea.vmem %s319_s23, 32  ;;  %p390_p1 = scmp.lt.s32.totalorder %s319_s23, %s319_s23 }
   0xc   :  { %370 = vmatprep.subr.mxu1 %v407_v1  ;;  %p386_p0 = scmp.ne.s32.totalorder %s319_s23, %s385_s4  ;;  %p391_p2 = scmp.lt.s32.totalorder %s385_s4, %s385_s4 }
   0xe   :  { %360 = vmatpush3.xpose.msk.msra.mxu0 %vm46_vm0, %v27_v7  ;;  %p392_p3 = por %p391_p2, %p390_p1 }
   0xf   :  { %375 = vmatprep.subr.mxu0 %v407_v1  ;;  %371 = vmatpush3.xpose.msk.msra.mxu1 %vm139_vm2, %v31_v9 }
  0x10   :  { %p393_p4 = pnand %p392_p3, %p386_p0 }
  0x11   :  { %362 = vmatmul.mubr.msk.f32.vlgmr.msra.gmra.mxu0 %vm46_vm0, %v39_v8 }
  0x12   :  { %377 = vmatprep.mubr.msk.f32.mxu0 %vm408_vm1, %v407_v1  ;;  %376 = vmatpush3.xpose.msk.msra.mxu0 %vm139_vm2, %v35_v15 }
  0xd1   :  { %v128_v11 = vpop.f32.mrf.mxu0 }
  0xd2   :  { %v129_v12 = vadd.f32 %v326_v10, %v128_v11 }
  0xd3   :  { %v363_v13 = vpop.f32.mrf.mxu0 }
  0xd4   :  { %v132_v14 = vmax.f32 %v129_v12, 0.0 }
  0xd6   :  { %373 = vmatmul.mubr.msk.f32.vlgmr.msra.gmra.mxu1 %vm139_vm2, %v132_v14 }
 0x196   :  { %v221_v17 = vpop.f32.mrf.mxu1 }
 0x197   :  { %v222_v18 = vadd.f32 %v332_v16, %v221_v17 }
 0x198   :  { %v374_v19 = vpop.f32.mrf.mxu1 }
 0x199   :  { %v225_v20 = vmax.f32 %v222_v18, 0.0 }
 0x19b   :  { %378 = vmatmul.mubr.msk.f32.vlgmr.msra.gmra.mxu0 %vm139_vm2, %v225_v20 }
 0x25b   :  { %v304_v22 = vpop.f32.mrf.mxu0 }
 0x25c   :  { %v305_v23 = vadd.f32 %v338_v21, %v304_v22 }
 0x25d   :  { %v379_v24 = vpop.f32.mrf.mxu0 }
 0x25e   :  { %383 = vtanh.f32 %v305_v23 }
 0x26b   :  { %v384_v25 = vpop.eup %383 }
 0x26c   :  { %v309_v26 = vmul.f32 2.0, %v384_v25 }
 0x26e   :  { %311 = vst.msk [vmem:[#allocation2] sm:$0x3] %vm310_vm3, %v309_v26 }
 0x26f   :  { %396 = shalt.err (!%p393_p4)
}
 0x270   :  { %321 = dma.vmem_to_hbm [thread:$0]  %s319_s23, 32, %s514_s7, [#allocation3]  }
 0x271   :  { %405 = dma.done.wait [#allocation3], 32  }
 0x272   :  { %406 = vsyncadd [#allocation3], 4294967264 }
 0x273   :  { %325 = vsyncpa [#allocation3], 1 }

</bundles_post_ra>
